<compile_context>
chip_gen: v6e
topology: v6e:2x2x1
jax: 0.10.0
libtpu: 0.0.40
codegen_flags: <defaults>
</compile_context>

<pallas_src>
import functools

import jax
import jax.numpy as jnp
import numpy as np
from jax.experimental import pallas as pl
from jax.experimental.pallas import tpu as pltpu

# Sizes implied by the module (fc1 = Linear(N*M, 2)).
N, M = 8, 4
L = N * M          # conv1d length
C1 = 20            # hidden complex channels of ComplexConv1d(1, 20)
C2 = 2 * C1        # stacked [real ; imag] hidden channels (sublane axis)
LANES = 128        # vreg lane width


def _pick_lane_groups(batch):
    """How many batch samples share one 128-lane row (k=1 convs make the
    length axis weight-free, so samples can be packed along it)."""
    for cand in (LANES // L, 2, 1):
        if batch % cand == 0:
            return cand
    return 1


def _make_kernel(g):
    def kernel(xr_ref, xi_ref, wch_ref, wbig_ref, sv_ref, out_ref):
        xr = xr_ref[...]                         # (tbg, g*L)  lane-dense
        xi = xi_ref[...]                         # (tbg, g*L)

        wch = wch_ref[...]                       # (5, 2*C1, 1) packed params
        a   = wch[0:1]                           # coeff of xr for [hr ; hi]
        bco = wch[1:2]                           # coeff of xi
        c   = wch[2:3]                           # combined conv1 bias
        wyr = wch[3:4]                           # conv2 weights -> yr
        wyi = wch[4:5]                           # conv2 weights -> yi
        sv  = sv_ref[...]                        # (4, 1) scalars

        # conv1 (k=1) + complex_relu, real/imag stacked on the channel
        # (sublane) axis: h = relu([hr ; hi]).  VPU only, 128-lane dense.
        h = jnp.maximum(xr[:, None, :] * a + xi[:, None, :] * bco + c, 0.0)

        # conv2 (k=1) + relu: exactly two sublane (XLU) reductions over 2*C1.
        yr = jnp.maximum(jnp.sum(h * wyr, axis=1) + sv[0:1, :], 0.0)
        yi = jnp.maximum(jnp.sum(h * wyi, axis=1) + sv[1:2, :], 0.0)
        mag = jnp.sqrt(yr * yr + yi * yi)        # (tbg, g*L)

        # fc1: per-sample reduce over L is a *segmented* lane reduce in this
        # packed layout -> fold it into one matmul on the otherwise-idle MXU
        # against a block-diagonal selector (x) fc-weight matrix.
        lm = jnp.dot(mag, wbig_ref[...],
                     preferred_element_type=jnp.float32)   # (tbg, 128)
        # ReLU on the logits mirrors the PyTorch module (relu before softmax).
        l0 = jnp.maximum(lm[:, 0:g] + sv[2:3, :], 0.0)      # (tbg, g)
        l1 = jnp.maximum(lm[:, g:2 * g] + sv[3:4, :], 0.0)  # (tbg, g)

        # log_softmax over the 2 classes: purely elementwise (VPU/EUP).
        mx = jnp.maximum(l0, l1)
        lse = jnp.log(jnp.exp(l0 - mx) + jnp.exp(l1 - mx)) + mx
        out_ref[0, :, :] = l0 - lse
        out_ref[1, :, :] = l1 - lse

    return kernel


def init_params(key):
    ks = jax.random.split(key, 9)
    s = 0.3
    w1r = jax.random.normal(ks[0], (1, C1, 1), jnp.float32) * s
    w1i = jax.random.normal(ks[1], (1, C1, 1), jnp.float32) * s
    b1r = jax.random.normal(ks[2], (1, C1, 1), jnp.float32) * s
    b1i = jax.random.normal(ks[3], (1, C1, 1), jnp.float32) * s
    w2r = jax.random.normal(ks[4], (1, C1, 1), jnp.float32) * s
    w2i = jax.random.normal(ks[5], (1, C1, 1), jnp.float32) * s
    b2  = jax.random.normal(ks[6], (2,), jnp.float32) * s        # [b2r, b2i]
    wfc = jax.random.normal(ks[7], (L, 2), jnp.float32) * s      # fc1.weight.T
    bfc = jax.random.normal(ks[8], (1, 2), jnp.float32) * s      # fc1.bias
    return (w1r, w1i, b1r, b1i, w2r, w2i, b2, wfc, bfc)


def pack_params(params, g):
    """Precompute every derived weight/bias combination once (host side)."""
    w1r, w1i, b1r, b1i, w2r, w2i, b2, wfc, bfc = params
    w1r, w1i = w1r.reshape(C1), w1i.reshape(C1)
    b1r, b1i = b1r.reshape(C1), b1i.reshape(C1)
    w2r, w2i = w2r.reshape(C1), w2i.reshape(C1)
    # Stacked h = [hr ; hi]:
    #   hr = relu(xr*w1r - xi*w1i + (b1r - b1i))
    #   hi = relu(xr*w1i + xi*w1r + (b1r + b1i))
    a   = jnp.concatenate([w1r,  w1i])                # coeff of xr
    bco = jnp.concatenate([-w1i, w1r])                # coeff of xi
    c   = jnp.concatenate([b1r - b1i, b1r + b1i])     # combined conv1 bias
    # conv2 channel reduction: yr = sum(h*[w2r;-w2i]), yi = sum(h*[w2i;w2r])
    wyr = jnp.concatenate([w2r, -w2i])
    wyi = jnp.concatenate([w2i,  w2r])
    wch = jnp.stack([a, bco, c, wyr, wyi])[:, :, None].astype(jnp.float32)

    # Block-diagonal selector (x) fc weights for the packed-lane layout:
    #   wbig[gi*L + l, k*g + gi] = wfc[l, k];  columns >= 2*g are zero pad.
    wfc_np = np.asarray(wfc, np.float32)              # (L, 2)
    wbig = np.zeros((g * L, LANES), np.float32)
    for k in range(2):
        for gi in range(g):
            wbig[gi * L:(gi + 1) * L, k * g + gi] = wfc_np[:, k]
    wbig = jnp.asarray(wbig)

    sv = jnp.stack([b2[0] - b2[1], b2[0] + b2[1],
                    bfc[0, 0], bfc[0, 1]]).reshape(4, 1).astype(jnp.float32)
    return wch, wbig, sv


@functools.partial(jax.jit, static_argnames=("g",))
def cnn_forward(xr, xi, wch, wbig, sv, *, g):
    # xr, xi: (B, N*M, 1), the PyTorch module's input convention.
    b = xr.shape[0]
    nbg = b // g                       # packed batch rows
    gl = g * L                         # lanes per row (128 when g = 4)

    # Rows per grid step: 128 packed rows = 512 samples -> h intermediate is
    # 128*40*128*4B ~= 2.6 MiB, comfortably inside v7x's 32 MiB scoped VMEM
    # with double-buffered inputs.  (Raise vmem_limit_bytes only if enlarging.)
    tbg = nbg if nbg <= 128 else 128
    assert nbg % tbg == 0, "pad batch upstream so tiles divide evenly"
    grid = (nbg // tbg,)

    # Free metadata-only ops: drop the trailing size-1 dim and pack g samples
    # per lane row (contiguous row-major reshape).  No concat, no extra HBM
    # pass in front of the kernel's own DMAs.
    xr2 = xr[:, :, 0].reshape(nbg, gl)
    xi2 = xi[:, :, 0].reshape(nbg, gl)

    out = pl.pallas_call(
        _make_kernel(g),
        out_shape=jax.ShapeDtypeStruct((2, nbg, g), jnp.float32),
        grid=grid,
        in_specs=[
            pl.BlockSpec((tbg, gl), lambda i: (i, 0)),        # xr (pipelined)
            pl.BlockSpec((tbg, gl), lambda i: (i, 0)),        # xi (pipelined)
            pl.BlockSpec((5, C2, 1), lambda i: (0, 0, 0)),    # channel params
            pl.BlockSpec((gl, LANES), lambda i: (0, 0)),      # fc/selector
            pl.BlockSpec((4, 1), lambda i: (0, 0)),           # scalars
        ],
        out_specs=pl.BlockSpec((2, tbg, g), lambda i: (0, i, 0)),
        compiler_params=pltpu.CompilerParams(
            dimension_semantics=("parallel",)),               # v7x: 2 TCs
    )(xr2, xi2, wch, wbig, sv)

    # (2, B/g, g) -> (2, B) is a free contiguous reshape; the transpose only
    # touches 2*B floats.
    return out.reshape(2, b).T


def reference(xr, xi, params):
    # Pure-JAX mirror of the PyTorch forward (for correctness checking).
    w1r, w1i, b1r, b1i, w2r, w2i, b2, wfc, bfc = params
    xr2 = jnp.transpose(xr, (0, 2, 1))[:, 0, :]
    xi2 = jnp.transpose(xi, (0, 2, 1))[:, 0, :]
    xr3, xi3 = xr2[:, None, :], xi2[:, None, :]
    hr = jnp.maximum(xr3 * w1r - xi3 * w1i + (b1r - b1i), 0.0)
    hi = jnp.maximum(xi3 * w1r + xr3 * w1i + (b1r + b1i), 0.0)
    yr = jnp.maximum((hr * w2r).sum(1) - (hi * w2i).sum(1) + (b2[0] - b2[1]), 0.0)
    yi = jnp.maximum((hi * w2r).sum(1) + (hr * w2i).sum(1) + (b2[0] + b2[1]), 0.0)
    mag = jnp.sqrt(yr * yr + yi * yi)
    logits = jnp.maximum(mag @ wfc + bfc, 0.0)
    return jax.nn.log_softmax(logits, axis=1)


if __name__ == "__main__":
    key = jax.random.PRNGKey(0)
    kx, kxi, kp = jax.random.split(key, 3)

    B = 8   # small demo batch; divisible by 128 // L = 4 -> fully lane-dense
    xr = jax.random.normal(kx, (B, N * M, 1), jnp.float32)
    xi = jax.random.normal(kxi, (B, N * M, 1), jnp.float32)

    params = init_params(kp)
    g = _pick_lane_groups(B)
    wch, wbig, sv = pack_params(params, g)

    out = cnn_forward(xr, xi, wch, wbig, sv, g=g)
    out = jax.block_until_ready(out)

    ref = reference(xr, xi, params)
    assert out.shape == (B, 2)
    assert jnp.allclose(out, ref, atol=1e-5, rtol=1e-5), (out, ref)
    print("KERNEL_OK")
</pallas_src>

<mosaic_0001>
module attributes {stable_mosaic.version = 11 : i64} {
  func.func @kernel(%arg0: i32, %arg1: memref<2x128xf32, #tpu.memory_space<vmem>>, %arg2: memref<2x128xf32, #tpu.memory_space<vmem>>, %arg3: memref<5x40x1xf32, #tpu.memory_space<vmem>>, %arg4: memref<128x128xf32, #tpu.memory_space<vmem>>, %arg5: memref<4x1xf32, #tpu.memory_space<vmem>>, %arg6: memref<2x2x4xf32, #tpu.memory_space<vmem>>) attributes {dimension_semantics = [#tpu.dimension_semantics<parallel>], iteration_bounds = array<i64: 1>, scalar_prefetch = 0 : i64, scratch_operands = 0 : i64, tpu.core_type = #tpu.core_type<tc>, window_params = [{transform_indices = @transform_0, window_bounds = array<i64: 2, 128>}, {transform_indices = @transform_1, window_bounds = array<i64: 2, 128>}, {pipeline_mode = #tpu.pipeline_mode<synchronous>, transform_indices = @transform_2, window_bounds = array<i64: 5, 40, 1>}, {pipeline_mode = #tpu.pipeline_mode<synchronous>, transform_indices = @transform_3, window_bounds = array<i64: 128, 128>}, {pipeline_mode = #tpu.pipeline_mode<synchronous>, transform_indices = @transform_4, window_bounds = array<i64: 4, 1>}, {transform_indices = @transform_5, window_bounds = array<i64: 2, 2, 4>}]} {
    %c0 = arith.constant 0 : index
    %c0_0 = arith.constant 0 : index
    %0 = vector.load %arg1[%c0, %c0_0] : memref<2x128xf32, #tpu.memory_space<vmem>>, vector<2x128xf32>
    %c0_1 = arith.constant 0 : index
    %c0_2 = arith.constant 0 : index
    %1 = vector.load %arg2[%c0_1, %c0_2] : memref<2x128xf32, #tpu.memory_space<vmem>>, vector<2x128xf32>
    %c0_3 = arith.constant 0 : index
    %c0_4 = arith.constant 0 : index
    %c0_5 = arith.constant 0 : index
    %2 = vector.load %arg3[%c0_3, %c0_4, %c0_5] : memref<5x40x1xf32, #tpu.memory_space<vmem>>, vector<5x40x1xf32>
    %3 = vector.extract_strided_slice %2 {offsets = [0, 0, 0], sizes = [1, 40, 1], strides = [1, 1, 1]} : vector<5x40x1xf32> to vector<1x40x1xf32>
    %4 = vector.extract_strided_slice %2 {offsets = [1, 0, 0], sizes = [1, 40, 1], strides = [1, 1, 1]} : vector<5x40x1xf32> to vector<1x40x1xf32>
    %5 = vector.extract_strided_slice %2 {offsets = [2, 0, 0], sizes = [1, 40, 1], strides = [1, 1, 1]} : vector<5x40x1xf32> to vector<1x40x1xf32>
    %6 = vector.extract_strided_slice %2 {offsets = [3, 0, 0], sizes = [1, 40, 1], strides = [1, 1, 1]} : vector<5x40x1xf32> to vector<1x40x1xf32>
    %7 = vector.extract_strided_slice %2 {offsets = [4, 0, 0], sizes = [1, 40, 1], strides = [1, 1, 1]} : vector<5x40x1xf32> to vector<1x40x1xf32>
    %c0_6 = arith.constant 0 : index
    %c0_7 = arith.constant 0 : index
    %8 = vector.load %arg5[%c0_6, %c0_7] : memref<4x1xf32, #tpu.memory_space<vmem>>, vector<4x1xf32>
    %9 = vector.shape_cast %0 : vector<2x128xf32> to vector<2x1x128xf32>
    %10 = vector.broadcast %9 : vector<2x1x128xf32> to vector<2x40x128xf32>
    %11 = vector.broadcast %3 : vector<1x40x1xf32> to vector<2x40x128xf32>
    %12 = arith.mulf %10, %11 : vector<2x40x128xf32>
    %13 = vector.shape_cast %1 : vector<2x128xf32> to vector<2x1x128xf32>
    %14 = vector.broadcast %13 : vector<2x1x128xf32> to vector<2x40x128xf32>
    %15 = vector.broadcast %4 : vector<1x40x1xf32> to vector<2x40x128xf32>
    %16 = arith.mulf %14, %15 : vector<2x40x128xf32>
    %17 = arith.addf %12, %16 : vector<2x40x128xf32>
    %18 = vector.broadcast %5 : vector<1x40x1xf32> to vector<2x40x128xf32>
    %19 = arith.addf %17, %18 : vector<2x40x128xf32>
    %cst = arith.constant 0.000000e+00 : f32
    %20 = vector.broadcast %cst : f32 to vector<2x40x128xf32>
    %21 = arith.maximumf %19, %20 : vector<2x40x128xf32>
    %22 = vector.broadcast %6 : vector<1x40x1xf32> to vector<2x40x128xf32>
    %23 = arith.mulf %21, %22 : vector<2x40x128xf32>
    %cst_8 = arith.constant dense<0.000000e+00> : vector<2x128xf32>
    %24 = vector.multi_reduction <add>, %23, %cst_8 [1] : vector<2x40x128xf32> to vector<2x128xf32>
    %25 = vector.extract_strided_slice %8 {offsets = [0, 0], sizes = [1, 1], strides = [1, 1]} : vector<4x1xf32> to vector<1x1xf32>
    %26 = vector.broadcast %25 : vector<1x1xf32> to vector<2x128xf32>
    %27 = arith.addf %24, %26 : vector<2x128xf32>
    %cst_9 = arith.constant 0.000000e+00 : f32
    %28 = vector.broadcast %cst_9 : f32 to vector<2x128xf32>
    %29 = arith.maximumf %27, %28 : vector<2x128xf32>
    %30 = vector.broadcast %7 : vector<1x40x1xf32> to vector<2x40x128xf32>
    %31 = arith.mulf %21, %30 : vector<2x40x128xf32>
    %cst_10 = arith.constant dense<0.000000e+00> : vector<2x128xf32>
    %32 = vector.multi_reduction <add>, %31, %cst_10 [1] : vector<2x40x128xf32> to vector<2x128xf32>
    %33 = vector.extract_strided_slice %8 {offsets = [1, 0], sizes = [1, 1], strides = [1, 1]} : vector<4x1xf32> to vector<1x1xf32>
    %34 = vector.broadcast %33 : vector<1x1xf32> to vector<2x128xf32>
    %35 = arith.addf %32, %34 : vector<2x128xf32>
    %cst_11 = arith.constant 0.000000e+00 : f32
    %36 = vector.broadcast %cst_11 : f32 to vector<2x128xf32>
    %37 = arith.maximumf %35, %36 : vector<2x128xf32>
    %38 = arith.mulf %29, %29 : vector<2x128xf32>
    %39 = arith.mulf %37, %37 : vector<2x128xf32>
    %40 = arith.addf %38, %39 : vector<2x128xf32>
    %41 = math.sqrt %40 : vector<2x128xf32>
    %c0_12 = arith.constant 0 : index
    %c0_13 = arith.constant 0 : index
    %42 = vector.load %arg4[%c0_12, %c0_13] : memref<128x128xf32, #tpu.memory_space<vmem>>, vector<128x128xf32>
    %cst_14 = arith.constant dense<0.000000e+00> : vector<2x128xf32>
    %43 = tpu.matmul %41, %42, %cst_14 {dimension_numbers = #tpu.dot_dimension_numbers<[1], [0], [0], [1], [0, 0, 1, 1], [], []>} : vector<2x128xf32>, vector<128x128xf32>, vector<2x128xf32> -> vector<2x128xf32>
    %44 = vector.extract_strided_slice %43 {offsets = [0, 0], sizes = [2, 4], strides = [1, 1]} : vector<2x128xf32> to vector<2x4xf32>
    %45 = vector.extract_strided_slice %8 {offsets = [2, 0], sizes = [1, 1], strides = [1, 1]} : vector<4x1xf32> to vector<1x1xf32>
    %46 = vector.broadcast %45 : vector<1x1xf32> to vector<2x4xf32>
    %47 = arith.addf %44, %46 : vector<2x4xf32>
    %cst_15 = arith.constant 0.000000e+00 : f32
    %48 = vector.broadcast %cst_15 : f32 to vector<2x4xf32>
    %49 = arith.maximumf %47, %48 : vector<2x4xf32>
    %50 = vector.extract_strided_slice %43 {offsets = [0, 4], sizes = [2, 4], strides = [1, 1]} : vector<2x128xf32> to vector<2x4xf32>
    %51 = vector.extract_strided_slice %8 {offsets = [3, 0], sizes = [1, 1], strides = [1, 1]} : vector<4x1xf32> to vector<1x1xf32>
    %52 = vector.broadcast %51 : vector<1x1xf32> to vector<2x4xf32>
    %53 = arith.addf %50, %52 : vector<2x4xf32>
    %cst_16 = arith.constant 0.000000e+00 : f32
    %54 = vector.broadcast %cst_16 : f32 to vector<2x4xf32>
    %55 = arith.maximumf %53, %54 : vector<2x4xf32>
    %56 = arith.maximumf %49, %55 : vector<2x4xf32>
    %57 = arith.subf %49, %56 : vector<2x4xf32>
    %58 = math.exp %57 : vector<2x4xf32>
    %59 = arith.subf %55, %56 : vector<2x4xf32>
    %60 = math.exp %59 : vector<2x4xf32>
    %61 = arith.addf %58, %60 : vector<2x4xf32>
    %62 = math.log %61 : vector<2x4xf32>
    %63 = arith.addf %62, %56 : vector<2x4xf32>
    %64 = arith.subf %49, %63 : vector<2x4xf32>
    %c0_17 = arith.constant 0 : index
    %c0_18 = arith.constant 0 : index
    %c0_19 = arith.constant 0 : index
    %65 = vector.load %arg6[%c0_17, %c0_18, %c0_19] : memref<2x2x4xf32, #tpu.memory_space<vmem>>, vector<1x2x4xf32>
    %66 = vector.shape_cast %65 : vector<1x2x4xf32> to vector<2x4xf32>
    %67 = vector.shape_cast %64 : vector<2x4xf32> to vector<1x2x4xf32>
    tpu.vector_store %arg6[%c0_17, %c0_18, %c0_19], %67 {strides = array<i32>} : memref<2x2x4xf32, #tpu.memory_space<vmem>>, vector<1x2x4xf32>,
    %68 = arith.subf %55, %63 : vector<2x4xf32>
    %c1 = arith.constant 1 : index
    %c0_20 = arith.constant 0 : index
    %c0_21 = arith.constant 0 : index
    %69 = vector.load %arg6[%c1, %c0_20, %c0_21] : memref<2x2x4xf32, #tpu.memory_space<vmem>>, vector<1x2x4xf32>
    %70 = vector.shape_cast %69 : vector<1x2x4xf32> to vector<2x4xf32>
    %71 = vector.shape_cast %68 : vector<2x4xf32> to vector<1x2x4xf32>
    tpu.vector_store %arg6[%c1, %c0_20, %c0_21], %71 {strides = array<i32>} : memref<2x2x4xf32, #tpu.memory_space<vmem>>, vector<1x2x4xf32>,
    return
  }
  func.func @transform_0(%arg0: i32) -> (i32, i32) {
    %c0_i32 = arith.constant 0 : i32
    %c0_i32_0 = arith.constant 0 : i32
    return %arg0, %c0_i32 : i32, i32
  }
  func.func @transform_1(%arg0: i32) -> (i32, i32) {
    %c0_i32 = arith.constant 0 : i32
    %c0_i32_0 = arith.constant 0 : i32
    return %arg0, %c0_i32 : i32, i32
  }
  func.func @transform_2(%arg0: i32) -> (i32, i32, i32) {
    %c0_i32 = arith.constant 0 : i32
    %c0_i32_0 = arith.constant 0 : i32
    %c0_i32_1 = arith.constant 0 : i32
    %c0_i32_2 = arith.constant 0 : i32
    return %c0_i32, %c0_i32_0, %c0_i32_1 : i32, i32, i32
  }
  func.func @transform_3(%arg0: i32) -> (i32, i32) {
    %c0_i32 = arith.constant 0 : i32
    %c0_i32_0 = arith.constant 0 : i32
    %c0_i32_1 = arith.constant 0 : i32
    return %c0_i32, %c0_i32_0 : i32, i32
  }
  func.func @transform_4(%arg0: i32) -> (i32, i32) {
    %c0_i32 = arith.constant 0 : i32
    %c0_i32_0 = arith.constant 0 : i32
    %c0_i32_1 = arith.constant 0 : i32
    return %c0_i32, %c0_i32_0 : i32, i32
  }
  func.func @transform_5(%arg0: i32) -> (i32, i32, i32) {
    %c0_i32 = arith.constant 0 : i32
    %c0_i32_0 = arith.constant 0 : i32
    %c0_i32_1 = arith.constant 0 : i32
    return %c0_i32, %arg0, %c0_i32_0 : i32, i32, i32
  }
}

</mosaic_0001>

<bundles_post_ra>
// kernel: squeeze.2
= control target key start
LH: loop header
LB: loop body
LE: loop exit
PB: predicated region body
PF: predicated region fallthrough
CT: control target
= control target key end

     0   :  { %s7_s6 = smov 3  ;;  %s14_s9 = smov 3  ;;  %vm4_vm0 = vcmask 261120   ;;  %vm11_vm1 = vcmask 1048320   ;;  %vm18_vm2 = vcmask 785920   ;;  %vm25_vm3 = vcmask 523520   ;;  %s69_s0 = inlined_call_operand.vmem [shape: f32[8,32], index: 0, kind: input, shape index: {}]   ;;  %s70_s1 = inlined_call_operand.vmem [shape: f32[2,128], index: 1, kind: output, shape index: {}]  }
   0x1   :  { %v35_v0 = vld [vmem:[%s69_s0 + $0x3] ss:$4 sm:%s7_s6]   ;;  %s41_s10 = smov 96   ;;  %s21_s11 = smov 3  ;;  %v36_v1 = vld [vmem:[%s69_s0 + $0x2] ss:$4 sm:%s14_s9]  }
   0x2   :  { %9 = vrot.lane.b32.xlu0 %v35_v0, %s41_s10  ;;  %v37_v2 = vld [vmem:[%s69_s0 + $0x1] ss:$4 sm:%s21_s11]   ;;  %s2_s16 = smov 3  ;;  %s42_s17 = smov 32  }
   0x3   :  { %23 = vrot.lane.b32.xlu1 %v37_v2, %s42_s17  ;;  %v3_v3 = vld [vmem:[%s69_s0] ss:$4 sm:%s2_s16]   ;;  %s43_s0 = smov 64  }
   0x4   :  { %5 = vst.msk [vmem:[#allocation0] sm:$0x3] %vm4_vm0, %v3_v3  }
   0x6   :  { %16 = vrot.lane.b32.xlu0 %v36_v1, %s43_s0 }
  0x74   :  { %v10_v4 = vpop.permute.xlu0 %9  }
  0x75   :  { %12 = vst.msk [vmem:[#allocation0] sm:$0x3] %vm11_vm1, %v10_v4   ;;  %v24_v5 = vpop.permute.xlu1 %23  }
  0x78   :  { %v17_v6 = vpop.permute.xlu0 %16  }
  0x79   :  { %19 = vst.msk [vmem:[#allocation0] sm:$0x3] %vm18_vm2, %v17_v6  }
  0x7a   :  { %26 = vst.msk [vmem:[#allocation0] sm:$0x3] %vm25_vm3, %v24_v5  }
  0x81   :  { %v31_v7 = vld [vmem:[#allocation0] sm:$0x3] }
  0x82   :  { %34 = vst [vmem:[%s70_s1] sm:$0x3] %v31_v7 }

// kernel: cnn_forward.1
= control target key start
LH: loop header
LB: loop body
LE: loop exit
PB: predicated region body
PF: predicated region fallthrough
CT: control target
= control target key end

     0   :  { %v610_v0 = vmov 0   ;;  %v611_v28 = vmov 0.0   ;;  %vm612_vm0 = vmmov 0   ;;  %v613_v47 = vmov 1966171168   ;;  %s614_s27 = smov 124   ;;  %s790_s2 = inlined_call_operand.vmem [shape: f32[5,40,1], index: 2, kind: input, shape index: {}]   ;;  %s791_s4 = inlined_call_operand.vmem [shape: f32[4,1], index: 4, kind: input, shape index: {}]   ;;  %s792_s3 = inlined_call_operand.vmem [shape: f32[128,128], index: 3, kind: input, shape index: {}]   ;;  %s793_s1 = inlined_call_operand.vmem [shape: f32[2,128], index: 1, kind: input, shape index: {}]   ;;  %s794_s0 = inlined_call_operand.vmem [shape: f32[2,128], index: 0, kind: input, shape index: {}]   ;;  %s795_s5 = inlined_call_operand.vmem [shape: f32[2,2,4], index: 5, kind: output, shape index: {}]  }
   0x1   :  { %599 = vset.pattern.permute.xlu1 %v610_v0  ;;  %598 = vset.pattern.permute.xlu0 %v610_v0  ;;  %v27_v1 = vld [vmem:[%s790_s2 + $0x28] sm:$0xff]  ;;  %v22_v2 = vld [vmem:[%s790_s2] sm:$0xff]  ;;  %v28_v3 = vld [vmem:[%s790_s2 + $0x30] sm:$0xff]  ;;  %v58_v48 = vunpack.c.l.s4 %v613_v47  ;;  %v60_v49 = vlaneseq  ;;  %vm403_vm2 = vcmask 1041409   ;;  %s615_s28 = smov 4   ;;  %vm512_vm6 = vcmask 25600  }
   0x2   :  { %151 = vperm.xlu1 %599, %v27_v1   ;;  %83 = vperm.xlu0 %598, %v22_v2   ;;  %v23_v4 = vld [vmem:[%s790_s2 + $0x8] sm:$0xff]  ;;  %v29_v5 = vld [vmem:[%s790_s2 + $0x38] sm:$0xff]  ;;  %v24_v6 = vld [vmem:[%s790_s2 + $0x10] sm:$0xff] }
   0x3   :  { %v667_v7 = vld [vmem:[%s791_s4] sm:$0xf]  ;;  %v25_v9 = vld [vmem:[%s790_s2 + $0x18] sm:$0xff]  ;;  %v32_v12 = vld [vmem:[%s790_s2 + $0x50] sm:$0xff]  ;;  %549 = vmatprep.subr.mxu0 %v611_v28  ;;  %581 = vmatprep.mubr.msk.f32.mxu0 %vm612_vm0, %v611_v28  ;;  %v59_v52 = vunpack.c.0.s8 %v58_v48  ;;  %v61_v53 = vshrl.u32 %v60_v49, 7 }
   0x4   :  { %v30_v8 = vld [vmem:[%s790_s2 + $0x40] sm:$0xff]  ;;  %584 = vpush %v667_v7  ;;  %v357_v10 = vrot.slane %v667_v7, 1  ;;  %v33_v11 = vld [vmem:[%s790_s2 + $0x58] sm:$0xff]  ;;  %v31_v13 = vld [vmem:[%s790_s2 + $0x48] sm:$0xff]  ;;  %v476_v45 = vrot.slane %v667_v7, 2  ;;  %v482_v46 = vrot.slane %v667_v7, 3 }
   0x5   :  { %v26_v14 = vld [vmem:[%s790_s2 + $0x20] sm:$0xff]  ;;  %v35_v15 = vld [vmem:[%s790_s2 + $0x68] sm:$0xff]  ;;  %v37_v18 = vld [vmem:[%s790_s2 + $0x78] sm:$0xff]  ;;  %v62_v58 = vsub.s32 %v59_v52, %v61_v53  ;;  %v73_v63 = vsub.s32 0, %v61_v53 }
   0x6   :  { %156 = vperm.xlu1 %599, %v28_v3   ;;  %88 = vperm.xlu0 %598, %v23_v4   ;;  %586 = vpush %v357_v10  ;;  %v34_v16 = vld [vmem:[%s790_s2 + $0x60] sm:$0xff]  ;;  %v43_v19 = vld [vmem:[%s790_s2 + $0xa8] sm:$0xff]  ;;  %v36_v22 = vld [vmem:[%s790_s2 + $0x70] sm:$0xff] }
   0x7   :  { %v38_v17 = vld [vmem:[%s790_s2 + $0x80] sm:$0xff]  ;;  %v39_v21 = vld [vmem:[%s790_s2 + $0x88] sm:$0xff]  ;;  %v40_v23 = vld [vmem:[%s790_s2 + $0x90] sm:$0xff]  ;;  %588 = vpush %v476_v45 }
   0x8   :  { %v42_v20 = vld [vmem:[%s790_s2 + $0xa0] sm:$0xff]  ;;  %v44_v24 = vld [vmem:[%s790_s2 + $0xb0] sm:$0xff]  ;;  %v41_v25 = vld [vmem:[%s790_s2 + $0x98] sm:$0xff]  ;;  %590 = vpush %v482_v46 }
   0x9   :  { %v45_v26 = vld [vmem:[%s790_s2 + $0xb8] sm:$0xff]  ;;  %v46_v27 = vld [vmem:[%s790_s2 + $0xc0] sm:$0xff]  ;;  %v399_v30 = vld [vmem:[%s792_s3 + $0x70] sm:$0xff] }
   0xa   :  { %161 = vperm.xlu1 %599, %v29_v5   ;;  %93 = vperm.xlu0 %598, %v24_v6   ;;  %v400_v29 = vld [vmem:[%s792_s3 + $0x78] sm:$0xff]  ;;  %v398_v31 = vld [vmem:[%s792_s3 + $0x68] sm:$0xff]  ;;  %v397_v32 = vld [vmem:[%s792_s3 + $0x60] sm:$0xff] }
   0xb   :  { %550 = vmatpush3.msra.mxu0 %v400_v29  ;;  %v396_v33 = vld [vmem:[%s792_s3 + $0x58] sm:$0xff]  ;;  %v395_v34 = vld [vmem:[%s792_s3 + $0x50] sm:$0xff]  ;;  %v394_v35 = vld [vmem:[%s792_s3 + $0x48] sm:$0xff] }
   0xc   :  { %551 = vmatprep.subr.mxu0 %v611_v28  ;;  %v393_v36 = vld [vmem:[%s792_s3 + $0x40] sm:$0xff]  ;;  %v392_v37 = vld [vmem:[%s792_s3 + $0x38] sm:$0xff]  ;;  %v391_v38 = vld [vmem:[%s792_s3 + $0x30] sm:$0xff] }
   0xd   :  { %552 = vmatpush3.msra.mxu0 %v399_v30  ;;  %v390_v39 = vld [vmem:[%s792_s3 + $0x28] sm:$0xff]  ;;  %v389_v40 = vld [vmem:[%s792_s3 + $0x20] sm:$0xff]  ;;  %v388_v41 = vld [vmem:[%s792_s3 + $0x18] sm:$0xff] }
   0xe   :  { %166 = vperm.xlu1 %599, %v30_v8   ;;  %98 = vperm.xlu0 %598, %v25_v9   ;;  %v387_v42 = vld [vmem:[%s792_s3 + $0x10] sm:$0xff]  ;;  %v386_v43 = vld [vmem:[%s792_s3 + $0x8] sm:$0xff]  ;;  %v385_v44 = vld [vmem:[%s792_s3] sm:$0xff] }
   0xf   :  { %553 = vmatprep.subr.mxu0 %v611_v28  ;;  %v530_v54 = vld.sshfl [vmem:[%s793_s1] sm:$0x11 pattern:$0x75316420] }
  0x10   :  { %554 = vmatpush3.msra.mxu0 %v398_v31  ;;  %v529_v57 = vld.sshfl [vmem:[%s794_s0] sm:$0x11 pattern:$0x75316420]  ;;  %v124_v59 = vcombine.high %v530_v54, %v530_v54  ;;  %v131_v0 = vrot.slane %v530_v54, %v62_v58 }
  0x11   :  { %555 = vmatprep.subr.mxu0 %v611_v28  ;;  %v56_v60 = vcombine.high %v529_v57, %v529_v57  ;;  %v63_v2 = vrot.slane %v529_v57, %v62_v58 }
  0x12   :  { %201 = vperm.xlu1 %599, %v33_v11   ;;  %196 = vperm.xlu0 %598, %v32_v12   ;;  %v138_v1 = vrot.slane %v124_v59, %v62_v58  ;;  %v142_v6 = vrot.slane %v131_v0, %v73_v63 }
  0x13   :  { %556 = vmatpush3.msra.mxu0 %v397_v32  ;;  %v70_v3 = vrot.slane %v56_v60, %v62_v58  ;;  %v74_v8 = vrot.slane %v63_v2, %v73_v63 }
  0x14   :  { %557 = vmatprep.subr.mxu0 %v611_v28  ;;  %v146_v7 = vrot.slane %v138_v1, %v73_v63 }
  0x15   :  { %558 = vmatpush3.msra.mxu0 %v396_v33  ;;  %v78_v9 = vrot.slane %v70_v3, %v73_v63 }
  0x16   :  { %171 = vperm.xlu1 %599, %v31_v13   ;;  %103 = vperm.xlu0 %598, %v26_v14  }
  0x17   :  { %559 = vmatprep.subr.mxu0 %v611_v28 }
  0x18   :  { %560 = vmatpush3.msra.mxu0 %v395_v34 }
  0x19   :  { %561 = vmatprep.subr.mxu0 %v611_v28 }
  0x1a   :  { %211 = vperm.xlu1 %599, %v35_v15   ;;  %206 = vperm.xlu0 %598, %v34_v16  }
  0x1b   :  { %562 = vmatpush3.msra.mxu0 %v394_v35 }
  0x1c   :  { %563 = vmatprep.subr.mxu0 %v611_v28 }
  0x1d   :  { %564 = vmatpush3.msra.mxu0 %v393_v36 }
  0x1e   :  { %246 = vperm.xlu1 %599, %v38_v17   ;;  %241 = vperm.xlu0 %598, %v37_v18  }
  0x1f   :  { %565 = vmatprep.subr.mxu0 %v611_v28 }
  0x20   :  { %566 = vmatpush3.msra.mxu0 %v392_v37 }
  0x21   :  { %567 = vmatprep.subr.mxu0 %v611_v28 }
  0x22   :  { %309 = vperm.xlu1 %599, %v43_v19   ;;  %304 = vperm.xlu0 %598, %v42_v20  }
  0x23   :  { %568 = vmatpush3.msra.mxu0 %v391_v38 }
  0x24   :  { %569 = vmatprep.subr.mxu0 %v611_v28 }
  0x25   :  { %570 = vmatpush3.msra.mxu0 %v390_v39 }
  0x26   :  { %251 = vperm.xlu1 %599, %v39_v21   ;;  %216 = vperm.xlu0 %598, %v36_v22  }
  0x27   :  { %571 = vmatprep.subr.mxu0 %v611_v28 }
  0x28   :  { %572 = vmatpush3.msra.mxu0 %v389_v40 }
  0x29   :  { %573 = vmatprep.subr.mxu0 %v611_v28 }
  0x2a   :  { %256 = vperm.xlu1 %599, %v40_v23   ;;  %314 = vperm.xlu0 %598, %v44_v24  }
  0x2b   :  { %574 = vmatpush3.msra.mxu0 %v388_v41 }
  0x2c   :  { %575 = vmatprep.subr.mxu0 %v611_v28 }
  0x2d   :  { %576 = vmatpush3.msra.mxu0 %v387_v42 }
  0x2e   :  { %261 = vperm.xlu1 %599, %v41_v25   ;;  %319 = vperm.xlu0 %598, %v45_v26  }
  0x2f   :  { %577 = vmatprep.subr.mxu0 %v611_v28 }
  0x30   :  { %578 = vmatpush3.msra.mxu0 %v386_v43 }
  0x31   :  { %579 = vmatprep.subr.mxu0 %v611_v28 }
  0x32   :  { %324 = vperm.xlu0 %598, %v46_v27   ;;  %580 = vmatpush3.msra.mxu0 %v385_v44 }
  0x35   :  { %s585_s0 = spop %584 }
  0x37   :  { %s587_s1 = spop %586 }
  0x38   :  { %s589_s25 = spop %588 }
  0x39   :  { %s591_s26 = spop %590 }
  0x7d   :  { %v152_v50 = vpop.permute.xlu1 %151  ;;  %v84_v51 = vpop.permute.xlu0 %83 }
  0x7e   :  { %v174_v12 = vmul.f32 %v152_v50, %v142_v6  ;;  %v179_v13 = vmul.f32 %v152_v50, %v146_v7  ;;  %v106_v14 = vmul.f32 %v84_v51, %v74_v8  ;;  %v111_v15 = vmul.f32 %v84_v51, %v78_v9 }
  0x80   :  { %v184_v22 = vadd.f32 %v174_v12, %v106_v14  ;;  %v189_v23 = vadd.f32 %v179_v13, %v111_v15 }
  0x81   :  { %v157_v55 = vpop.permute.xlu1 %156  ;;  %v89_v56 = vpop.permute.xlu0 %88 }
  0x82   :  { %v175_v18 = vmul.f32 %v157_v55, %v142_v6  ;;  %v180_v19 = vmul.f32 %v157_v55, %v146_v7  ;;  %v107_v20 = vmul.f32 %v89_v56, %v74_v8  ;;  %v112_v21 = vmul.f32 %v89_v56, %v78_v9 }
  0x84   :  { %v185_v28 = vadd.f32 %v175_v18, %v107_v20  ;;  %v190_v29 = vadd.f32 %v180_v19, %v112_v21 }
  0x85   :  { %v162_v61 = vpop.permute.xlu1 %161  ;;  %v94_v62 = vpop.permute.xlu0 %93 }
  0x86   :  { %v176_v26 = vmul.f32 %v162_v61, %v142_v6  ;;  %v181_v27 = vmul.f32 %v162_v61, %v146_v7  ;;  %v108_v30 = vmul.f32 %v94_v62, %v74_v8  ;;  %v113_v31 = vmul.f32 %v94_v62, %v78_v9 }
  0x88   :  { %v186_v42 = vadd.f32 %v176_v26, %v108_v30  ;;  %v191_v43 = vadd.f32 %v181_v27, %v113_v31 }
  0x89   :  { %v167_v4 = vpop.permute.xlu1 %166  ;;  %v99_v5 = vpop.permute.xlu0 %98 }
  0x8a   :  { %v177_v32 = vmul.f32 %v167_v4, %v142_v6  ;;  %v182_v33 = vmul.f32 %v167_v4, %v146_v7  ;;  %v109_v34 = vmul.f32 %v99_v5, %v74_v8  ;;  %v114_v35 = vmul.f32 %v99_v5, %v78_v9 }
  0x8c   :  { %v187_v46 = vadd.f32 %v177_v32, %v109_v34  ;;  %v192_v47 = vadd.f32 %v182_v33, %v114_v35 }
  0x8d   :  { %v202_v10 = vpop.permute.xlu1 %201  ;;  %v197_v11 = vpop.permute.xlu0 %196 }
  0x8e   :  { %v220_v36 = vadd.f32 %v202_v10, %v185_v28  ;;  %v225_v37 = vadd.f32 %v202_v10, %v190_v29  ;;  %v219_v38 = vadd.f32 %v197_v11, %v184_v22  ;;  %v224_v39 = vadd.f32 %v197_v11, %v189_v23 }
  0x90   :  { %v230_v44 = vmax.f32 %v220_v36, 0.0  ;;  %v235_v45 = vmax.f32 %v225_v37, 0.0  ;;  %v229_v48 = vmax.f32 %v219_v38, 0.0  ;;  %v234_v49 = vmax.f32 %v224_v39, 0.0 }
  0x91   :  { %v172_v16 = vpop.permute.xlu1 %171  ;;  %v104_v17 = vpop.permute.xlu0 %103 }
  0x92   :  { %v178_v54 = vmul.f32 %v172_v16, %v142_v6  ;;  %v183_v55 = vmul.f32 %v172_v16, %v146_v7  ;;  %v110_v56 = vmul.f32 %v104_v17, %v74_v8  ;;  %v115_v57 = vmul.f32 %v104_v17, %v78_v9 }
  0x94   :  { %v188_v4 = vadd.f32 %v178_v54, %v110_v56  ;;  %v193_v5 = vadd.f32 %v183_v55, %v115_v57 }
  0x95   :  { %v212_v24 = vpop.permute.xlu1 %211  ;;  %v207_v25 = vpop.permute.xlu0 %206 }
  0x96   :  { %v221_v50 = vadd.f32 %v207_v25, %v186_v42  ;;  %v226_v51 = vadd.f32 %v207_v25, %v191_v43  ;;  %v222_v58 = vadd.f32 %v212_v24, %v187_v46  ;;  %v227_v59 = vadd.f32 %v212_v24, %v192_v47 }
  0x98   :  { %v231_v0 = vmax.f32 %v221_v50, 0.0  ;;  %v236_v1 = vmax.f32 %v226_v51, 0.0  ;;  %v232_v10 = vmax.f32 %v222_v58, 0.0  ;;  %v237_v11 = vmax.f32 %v227_v59, 0.0 }
  0x99   :  { %v247_v40 = vpop.permute.xlu1 %246  ;;  %v242_v41 = vpop.permute.xlu0 %241 }
  0x9a   :  { %v265_v60 = vmul.f32 %v247_v40, %v230_v44  ;;  %v270_v61 = vmul.f32 %v247_v40, %v235_v45  ;;  %v264_v62 = vmul.f32 %v242_v41, %v229_v48  ;;  %v269_v63 = vmul.f32 %v242_v41, %v234_v49 }
  0x9c   :  { %v274_v6 = vadd.f32 %v265_v60, %v264_v62  ;;  %v284_v7 = vadd.f32 %v270_v61, %v269_v63 }
  0x9d   :  { %v310_v52 = vpop.permute.xlu1 %309  ;;  %v305_v53 = vpop.permute.xlu0 %304 }
  0x9e   :  { %v328_v14 = vmul.f32 %v310_v52, %v230_v44  ;;  %v333_v15 = vmul.f32 %v310_v52, %v235_v45  ;;  %v327_v16 = vmul.f32 %v305_v53, %v229_v48  ;;  %v332_v17 = vmul.f32 %v305_v53, %v234_v49 }
  0xa0   :  { %v337_v28 = vadd.f32 %v328_v14, %v327_v16  ;;  %v347_v29 = vadd.f32 %v333_v15, %v332_v17 }
  0xa1   :  { %v252_v2 = vpop.permute.xlu1 %251  ;;  %v217_v3 = vpop.permute.xlu0 %216 }
  0xa2   :  { %v266_v12 = vmul.f32 %v252_v2, %v231_v0  ;;  %v271_v13 = vmul.f32 %v252_v2, %v236_v1  ;;  %v223_v8 = vadd.f32 %v217_v3, %v188_v4  ;;  %v228_v9 = vadd.f32 %v217_v3, %v193_v5 }
  0xa4   :  { %v275_v22 = vadd.f32 %v274_v6, %v266_v12  ;;  %v285_v23 = vadd.f32 %v284_v7, %v271_v13  ;;  %v233_v26 = vmax.f32 %v223_v8, 0.0  ;;  %v238_v27 = vmax.f32 %v228_v9, 0.0 }
  0xa5   :  { %v257_v18 = vpop.permute.xlu1 %256  ;;  %v315_v19 = vpop.permute.xlu0 %314  ;;  %v359_v6 = vstv %s587_s1 }
  0xa6   :  { %v267_v20 = vmul.f32 %v257_v18, %v232_v10  ;;  %v272_v21 = vmul.f32 %v257_v18, %v237_v11  ;;  %v329_v24 = vmul.f32 %v315_v19, %v231_v0  ;;  %v334_v25 = vmul.f32 %v315_v19, %v236_v1 }
  0xa7   :  { %v296_v1 = vstv %s585_s0 }
  0xa8   :  { %v276_v30 = vadd.f32 %v275_v22, %v267_v20  ;;  %v286_v31 = vadd.f32 %v285_v23, %v272_v21  ;;  %v338_v38 = vadd.f32 %v337_v28, %v329_v24  ;;  %v348_v39 = vadd.f32 %v347_v29, %v334_v25 }
  0xa9   :  { %v262_v32 = vpop.permute.xlu1 %261  ;;  %v320_v33 = vpop.permute.xlu0 %319 }
  0xaa   :  { %v268_v34 = vmul.f32 %v262_v32, %v233_v26  ;;  %v273_v35 = vmul.f32 %v262_v32, %v238_v27  ;;  %v330_v36 = vmul.f32 %v320_v33, %v232_v10  ;;  %v335_v37 = vmul.f32 %v320_v33, %v237_v11 }
  0xac   :  { %v277_v40 = vadd.f32 %v276_v30, %v268_v34  ;;  %v287_v41 = vadd.f32 %v286_v31, %v273_v35  ;;  %v339_v42 = vadd.f32 %v338_v38, %v330_v36  ;;  %v349_v43 = vadd.f32 %v348_v39, %v335_v37 }
  0xad   :  { %v325_v44 = vpop.permute.xlu0 %324  ;;  %v478_v36 = vstv %s589_s25  ;;  %v484_v37 = vstv %s591_s26 }
  0xae   :  { %v278_v45 = vrot.slane %v277_v40, 4  ;;  %v288_v46 = vrot.slane %v287_v41, 4  ;;  %v331_v47 = vmul.f32 %v325_v44, %v233_v26  ;;  %v336_v48 = vmul.f32 %v325_v44, %v238_v27 }
  0xb0   :  { %v279_v49 = vadd.f32 %v278_v45, %v277_v40  ;;  %v289_v50 = vadd.f32 %v288_v46, %v287_v41  ;;  %v340_v51 = vadd.f32 %v339_v42, %v331_v47  ;;  %v350_v52 = vadd.f32 %v349_v43, %v336_v48 }
  0xb2   :  { %v341_v53 = vrot.slane %v340_v51, 4  ;;  %v351_v54 = vrot.slane %v350_v52, 4  ;;  %v280_v55 = vrot.slane %v279_v49, 2  ;;  %v290_v56 = vrot.slane %v289_v50, 2 }
  0xb4   :  { %v342_v57 = vadd.f32 %v341_v53, %v340_v51  ;;  %v352_v58 = vadd.f32 %v351_v54, %v350_v52  ;;  %v281_v59 = vadd.f32 %v280_v55, %v279_v49  ;;  %v291_v60 = vadd.f32 %v290_v56, %v289_v50 }
  0xb6   :  { %v282_v61 = vrot.slane %v281_v59, 1  ;;  %v292_v62 = vrot.slane %v291_v60, 1  ;;  %v343_v63 = vrot.slane %v342_v57, 2  ;;  %v353_v0 = vrot.slane %v352_v58, 2 }
  0xb8   :  { %v283_v2 = vadd.f32 %v282_v61, %v281_v59  ;;  %v293_v3 = vadd.f32 %v292_v62, %v291_v60  ;;  %v344_v4 = vadd.f32 %v343_v63, %v342_v57  ;;  %v354_v5 = vadd.f32 %v353_v0, %v352_v58 }
  0xba   :  { %v298_v10 = vadd.f32 %v296_v1, %v283_v2  ;;  %v299_v11 = vadd.f32 %v296_v1, %v293_v3  ;;  %v345_v12 = vrot.slane %v344_v4, 1  ;;  %v355_v13 = vrot.slane %v354_v5, 1 }
  0xbc   :  { %v346_v7 = vadd.f32 %v345_v12, %v344_v4  ;;  %v356_v8 = vadd.f32 %v355_v13, %v354_v5  ;;  %v300_v9 = vmax.f32 %v298_v10, 0.0  ;;  %v301_v14 = vmax.f32 %v299_v11, 0.0 }
  0xbe   :  { %v361_v15 = vadd.f32 %v359_v6, %v346_v7  ;;  %v362_v16 = vadd.f32 %v359_v6, %v356_v8  ;;  %v365_v19 = vmul.f32 %v300_v9, %v300_v9  ;;  %v366_v20 = vmul.f32 %v301_v14, %v301_v14 }
  0xc0   :  { %v363_v17 = vmax.f32 %v361_v15, 0.0  ;;  %v364_v18 = vmax.f32 %v362_v16, 0.0 }
  0xc2   :  { %v367_v21 = vmul.f32 %v363_v17, %v363_v17  ;;  %v368_v22 = vmul.f32 %v364_v18, %v364_v18 }
  0xc4   :  { %v369_v23 = vadd.f32 %v367_v21, %v365_v19  ;;  %v370_v24 = vadd.f32 %v368_v22, %v366_v20 }
  0xc6   :  { %600 = vrsqrt.f32 %v369_v23  ;;  %vm373_vm1 = vcmp.eq.f32.partialorder %v369_v23, inf  ;;  %v376_v28 = vand.u32 2147483648, %v369_v23  ;;  %vm375_vm3 = vcmp.eq.f32.partialorder %v369_v23, 0.0 }
  0xc7   :  { %602 = vrsqrt.f32 %v370_v24  ;;  %vm380_vm4 = vcmp.eq.f32.partialorder %v370_v24, inf  ;;  %v383_v31 = vand.u32 2147483648, %v370_v24  ;;  %vm382_vm5 = vcmp.eq.f32.partialorder %v370_v24, 0.0 }
  0xd3   :  { %v601_v25 = vpop.eup %600 }
  0xd4   :  { %v603_v26 = vpop.eup %602  ;;  %v372_v27 = vmul.f32 %v601_v25, %v369_v23 }
  0xd5   :  { %v379_v29 = vmul.f32 %v603_v26, %v370_v24 }
  0xd6   :  { %v374_v30 = vsel %vm373_vm1, %v369_v23, %v372_v27 }
  0xd7   :  { %v377_v32 = vsel %vm375_vm3, %v376_v28, %v374_v30  ;;  %v381_v33 = vsel %vm380_vm4, %v370_v24, %v379_v29 }
  0xd8   :  { %v384_v34 = vsel %vm382_vm5, %v383_v31, %v381_v33 }
  0xd9   :  { %v404_v35 = vsel %vm403_vm2, %v384_v34, %v377_v32 }
  0xda   :  { %582 = vmatmul.mubr.f32.vlgmr.msra.gmra.mxu0 %v404_v35 }
 0x19a   :  { %v472_v38 = vpop.f32.mrf.mxu0 }
 0x19b   :  { %v480_v39 = vadd.f32 %v478_v36, %v472_v38  ;;  %v486_v40 = vadd.f32 %v484_v37, %v472_v38 }
 0x19c   :  { %v583_v41 = vpop.f32.mrf.mxu0 }
 0x19d   :  { %v487_v42 = vmax.f32 %v486_v40, 0.0  ;;  %v481_v43 = vmax.f32 %v480_v39, 0.0 }
 0x19f   :  { %489 = vrot.lane.b32.xlu1 %v487_v42, %s614_s27 }
 0x211   :  { %v490_v44 = vpop.permute.xlu1 %489 }
 0x212   :  { %v492_v45 = vmax.f32 %v481_v43, %v490_v44 }
 0x214   :  { %497 = vrot.lane.b32.xlu0 %v492_v45, %s615_s28  ;;  %v493_v50 = vsub.f32 %v481_v43, %v492_v45 }
 0x216   :  { %v494_v51 = vmul.f32 1.442695, %v493_v50 }
 0x286   :  { %v498_v46 = vpop.permute.xlu0 %497 }
 0x287   :  { %v500_v47 = vsub.f32 %v487_v42, %v498_v46 }
 0x289   :  { %v501_v48 = vmul.f32 1.442695, %v500_v47 }
 0x28b   :  { %604 = vpow2.f32 %v501_v48 }
 0x28c   :  { %606 = vpow2.f32 %v494_v51 }
 0x298   :  { %v605_v49 = vpop.eup %604 }
 0x299   :  { %504 = vrot.lane.b32.xlu1 %v605_v49, %s614_s27  ;;  %v607_v52 = vpop.eup %606 }
 0x30b   :  { %v505_v53 = vpop.permute.xlu1 %504 }
 0x30c   :  { %v507_v54 = vadd.f32 %v607_v52, %v505_v53 }
 0x30e   :  { %608 = vlog2.f32 %v507_v54 }
 0x31b   :  { %v609_v55 = vpop.eup %608 }
 0x31c   :  { %v509_v56 = vmul.f32 0.6931472, %v609_v55 }
 0x31e   :  { %v510_v57 = vadd.f32 %v509_v56, %v492_v45 }
 0x320   :  { %515 = vrot.lane.b32.xlu0 %v510_v57, %s615_s28  ;;  %v511_v58 = vsub.f32 %v481_v43, %v510_v57 }
 0x322   :  { %513 = vst.msk [vmem:[%s795_s5] sm:$0x3] %vm512_vm6, %v511_v58 }
 0x392   :  { %v516_v59 = vpop.permute.xlu0 %515 }
 0x393   :  { %v518_v60 = vsub.f32 %v487_v42, %v516_v59 }
 0x395   :  { %520 = vrot.lane.b32.xlu1 %v518_v60, %s614_s27 }
 0x407   :  { %v521_v61 = vpop.permute.xlu1 %520 }
 0x408   :  { %531 = vst.msk [vmem:[%s795_s5 + $0x2] sm:$0x3] %vm512_vm6, %v521_v61 }

</bundles_post_ra>
